<compile_context>
chip_gen: v7x
topology: tpu7x:2x2x1
jax: 0.10.0
libtpu: 0.0.40
codegen_flags: <defaults>
</compile_context>

<pallas_src>
import functools

import jax
import jax.numpy as jnp
from jax import lax
from jax.experimental import pallas as pl
from jax.experimental.pallas import tpu as pltpu


def _sigmoid(x):
    # EUP-friendly, Mosaic-safe sigmoid.
    return 0.5 * (jnp.tanh(0.5 * x) + 1.0)


def _bilstm_step_kernel(lens_ref, x_ref, w_ih_ref, w_hh_ref, b_ref,
                        out_ref, hn_ref, cn_ref, h_scr, c_scr,
                        *, hidden_size: int, seq_len: int):
    """One (direction, time-step) grid point of a bidirectional LSTM.

    grid = (2, T): axis 0 = direction (0 forward, 1 backward; independent), axis 1 is
    the sequential recurrence over time.  The recurrent (h, c) state lives in VMEM
    scratch and is reset at t == 0 of each direction.
    """
    hs = hidden_size
    d = pl.program_id(0)
    t = pl.program_id(1)

    # True time index for this step (forward counts up, backward counts down).
    # Pure integer arithmetic, identical to the index_maps.
    tt = d * (seq_len - 1) + t - 2 * d * t

    @pl.when(t == 0)
    def _():
        h_scr[...] = jnp.zeros_like(h_scr)
        c_scr[...] = jnp.zeros_like(c_scr)

    x_t = x_ref[0]            # (B, E)   f32 or bf16 (cast done in HBM by the wrapper)
    w_ih = w_ih_ref[0]        # (E, 4H)  f32 or bf16 (resident per direction)
    w_hh = w_hh_ref[0]        # (H, 4H)  f32 or bf16 (resident per direction)
    b = b_ref[0]              # (1, 4H)  f32

    h_prev = h_scr[...]       # (B, H) f32
    c_prev = c_scr[...]

    gates = (
        jnp.dot(x_t, w_ih, preferred_element_type=jnp.float32)
        + jnp.dot(h_prev.astype(w_hh.dtype), w_hh, preferred_element_type=jnp.float32)
        + b
    )                          # (B, 4H) f32 accumulation; PyTorch gate order i, f, g, o

    i_g = _sigmoid(gates[:, 0 * hs:1 * hs])
    f_g = _sigmoid(gates[:, 1 * hs:2 * hs])
    g_g = jnp.tanh(gates[:, 2 * hs:3 * hs])
    o_g = _sigmoid(gates[:, 3 * hs:4 * hs])

    c_new = f_g * c_prev + i_g * g_g
    h_new = o_g * jnp.tanh(c_new)

    # pack_padded_sequence semantics: invalid steps freeze the state and emit zeros.
    valid = lens_ref[...] > tt                       # (B, 1) bool
    h_next = jnp.where(valid, h_new, h_prev)
    c_next = jnp.where(valid, c_new, c_prev)

    h_scr[...] = h_next
    c_scr[...] = c_next

    out_ref[0, 0] = jnp.where(valid, h_new, 0.0).astype(out_ref.dtype)
    # h_n / c_n blocks are resident per direction; the final (t == T-1) value is what
    # lands in HBM when the direction block retires.
    hn_ref[0] = h_next.astype(hn_ref.dtype)
    cn_ref[0] = c_next.astype(cn_ref.dtype)


def encoder_forward(embedded_inputs, input_lengths, params, *, use_bf16_matmul=False):
    """Pallas BiLSTM encoder.

    embedded_inputs: [B, T, E] (batch_first), input_lengths: [B] ints.
    params: PyTorch nn.LSTM(bidirectional=True) layer-0 tensors:
        weight_ih_l0 [4H,E], weight_hh_l0 [4H,H], bias_ih_l0 [4H], bias_hh_l0 [4H]
        and the *_reverse counterparts.
    Returns (outputs [B, T, 2H], (h_n [2, B, H], c_n [2, B, H])).
    """
    B, T, E = embedded_inputs.shape
    H = params["weight_hh_l0"].shape[1]
    G = 4 * H
    f32 = jnp.float32
    mxu_dtype = jnp.bfloat16 if use_bf16_matmul else jnp.float32

    # Per perf review: cast / lay out operands once in HBM (no per-step in-kernel casts,
    # no padded copies — every BlockSpec below uses full-extent last-two dims).
    x_tbe = jnp.transpose(embedded_inputs, (1, 0, 2)).astype(mxu_dtype)          # (T, B, E)
    w_ih_t = jnp.stack([params["weight_ih_l0"].T,
                        params["weight_ih_l0_reverse"].T]).astype(mxu_dtype)     # (2, E, 4H)
    w_hh_t = jnp.stack([params["weight_hh_l0"].T,
                        params["weight_hh_l0_reverse"].T]).astype(mxu_dtype)     # (2, H, 4H)
    bias = jnp.stack([params["bias_ih_l0"] + params["bias_hh_l0"],
                      params["bias_ih_l0_reverse"] + params["bias_hh_l0_reverse"]]
                     ).reshape(2, 1, G).astype(f32)                               # (2, 1, 4H)
    lens = jnp.asarray(input_lengths, dtype=jnp.int32).reshape(B, 1)              # (B, 1)

    def time_block(d, t):
        # forward: t ; backward: T-1-t
        return d * (T - 1) + t - 2 * d * t

    kernel = functools.partial(_bilstm_step_kernel, hidden_size=H, seq_len=T)

    itemsize = 2 if use_bf16_matmul else 4
    flops = 2 * T * (2 * B * E * G + 2 * B * H * G + 12 * B * H)
    transcendentals = 2 * T * 5 * B * H
    bytes_accessed = (2 * T * B * E * itemsize + 2 * (E + H) * G * itemsize
                      + 2 * G * 4 + B * 4 + (2 * T * B * H + 4 * B * H) * 4)

    out_dtbh, h_n, c_n = pl.pallas_call(
        kernel,
        out_shape=(
            jax.ShapeDtypeStruct((2, T, B, H), f32),   # per-direction outputs
            jax.ShapeDtypeStruct((2, B, H), f32),      # h_n
            jax.ShapeDtypeStruct((2, B, H), f32),      # c_n
        ),
        grid=(2, T),
        in_specs=[
            pl.BlockSpec((B, 1), lambda d, t: (0, 0)),                         # lengths (resident)
            pl.BlockSpec((1, B, E), lambda d, t: (time_block(d, t), 0, 0)),    # x_t
            pl.BlockSpec((1, E, G), lambda d, t: (d, 0, 0)),                   # W_ih (per dir)
            pl.BlockSpec((1, H, G), lambda d, t: (d, 0, 0)),                   # W_hh (per dir)
            pl.BlockSpec((1, 1, G), lambda d, t: (d, 0, 0)),                   # bias (per dir)
        ],
        out_specs=(
            pl.BlockSpec((1, 1, B, H), lambda d, t: (d, time_block(d, t), 0, 0)),
            pl.BlockSpec((1, B, H), lambda d, t: (d, 0, 0)),
            pl.BlockSpec((1, B, H), lambda d, t: (d, 0, 0)),
        ),
        scratch_shapes=[
            pltpu.VMEM((B, H), jnp.float32),   # recurrent h
            pltpu.VMEM((B, H), jnp.float32),   # recurrent c
        ],
        compiler_params=pltpu.CompilerParams(
            dimension_semantics=("parallel", "arbitrary"),  # directions independent;
            vmem_limit_bytes=32 * 1024 * 1024,              # time axis is the recurrence
        ),
        cost_estimate=pl.CostEstimate(
            flops=int(flops),
            transcendentals=int(transcendentals),
            bytes_accessed=int(bytes_accessed),
        ),
    )(lens, x_tbe, w_ih_t, w_hh_t, bias)

    # (2, T, B, H) -> (B, T, 2H): forward features first, backward second (PyTorch layout).
    outputs = jnp.transpose(out_dtbh, (2, 1, 0, 3)).reshape(B, T, 2 * H)
    return outputs, (h_n, c_n)


def encoder_reference(embedded_inputs, input_lengths, params):
    """Pure-JAX f32 reference (pack_padded -> BiLSTM -> pad_packed semantics)."""
    B, T, E = embedded_inputs.shape
    H = params["weight_hh_l0"].shape[1]
    hi = jax.lax.Precision.HIGHEST
    mask_tb = (jnp.arange(T)[:, None] < jnp.asarray(input_lengths)[None, :]).astype(jnp.float32)
    x_tbe = jnp.transpose(embedded_inputs, (1, 0, 2)).astype(jnp.float32)

    def run(x_seq, m_seq, w_ih, w_hh, b):
        def step(carry, inp):
            h, c = carry
            x_t, m = inp
            gates = (jnp.dot(x_t, w_ih.T, precision=hi)
                     + jnp.dot(h, w_hh.T, precision=hi) + b)
            i = jax.nn.sigmoid(gates[:, 0 * H:1 * H])
            f = jax.nn.sigmoid(gates[:, 1 * H:2 * H])
            g = jnp.tanh(gates[:, 2 * H:3 * H])
            o = jax.nn.sigmoid(gates[:, 3 * H:4 * H])
            c_new = f * c + i * g
            h_new = o * jnp.tanh(c_new)
            mm = m[:, None]
            h2 = jnp.where(mm > 0, h_new, h)
            c2 = jnp.where(mm > 0, c_new, c)
            return (h2, c2), jnp.where(mm > 0, h_new, 0.0)

        init = (jnp.zeros((B, H), jnp.float32), jnp.zeros((B, H), jnp.float32))
        (h_last, c_last), outs = lax.scan(step, init, (x_seq, m_seq))
        return outs, h_last, c_last

    b_f = params["bias_ih_l0"] + params["bias_hh_l0"]
    b_b = params["bias_ih_l0_reverse"] + params["bias_hh_l0_reverse"]
    out_f, hn_f, cn_f = run(x_tbe, mask_tb,
                            params["weight_ih_l0"], params["weight_hh_l0"], b_f)
    out_b_rev, hn_b, cn_b = run(x_tbe[::-1], mask_tb[::-1],
                                params["weight_ih_l0_reverse"], params["weight_hh_l0_reverse"], b_b)
    out_b = out_b_rev[::-1]
    outputs = jnp.transpose(jnp.concatenate([out_f, out_b], axis=-1), (1, 0, 2))
    return outputs, (jnp.stack([hn_f, hn_b]), jnp.stack([cn_f, cn_b]))


if __name__ == "__main__":
    B, T, E, H = 2, 8, 32, 32   # batch, seq, embedding_dim, hidden_size

    key = jax.random.PRNGKey(0)
    k_x, *k_w = jax.random.split(key, 9)

    embedded_inputs = jax.random.normal(k_x, (B, T, E), dtype=jnp.float32)
    # Sorted descending, as pack_padded_sequence(enforce_sorted=True) requires.
    input_lengths = jnp.array([T, 5], dtype=jnp.int32)

    bound = 1.0 / float(H) ** 0.5

    def _u(k, shape):
        return jax.random.uniform(k, shape, minval=-bound, maxval=bound, dtype=jnp.float32)

    params = {
        "weight_ih_l0": _u(k_w[0], (4 * H, E)),
        "weight_hh_l0": _u(k_w[1], (4 * H, H)),
        "bias_ih_l0": _u(k_w[2], (4 * H,)),
        "bias_hh_l0": _u(k_w[3], (4 * H,)),
        "weight_ih_l0_reverse": _u(k_w[4], (4 * H, E)),
        "weight_hh_l0_reverse": _u(k_w[5], (4 * H, H)),
        "bias_ih_l0_reverse": _u(k_w[6], (4 * H,)),
        "bias_hh_l0_reverse": _u(k_w[7], (4 * H,)),
    }

    ref_out, (ref_hn, ref_cn) = encoder_reference(embedded_inputs, input_lengths, params)

    # Exact-semantics path: f32 operands, f32 accumulation.
    out, (h_n, c_n) = jax.block_until_ready(
        encoder_forward(embedded_inputs, input_lengths, params, use_bf16_matmul=False))
    assert out.shape == (B, T, 2 * H)
    assert h_n.shape == (2, B, H) and c_n.shape == (2, B, H)
    assert jnp.allclose(out, ref_out, atol=1e-2, rtol=1e-2), float(jnp.max(jnp.abs(out - ref_out)))
    assert jnp.allclose(h_n, ref_hn, atol=1e-2, rtol=1e-2)
    assert jnp.allclose(c_n, ref_cn, atol=1e-2, rtol=1e-2)
    # Padded time steps of row 1 (length 5) are exactly zero (pad_packed_sequence).
    assert jnp.all(out[1, 5:, :] == 0.0)
    assert jnp.all(jnp.isfinite(out))

    # Fast path: bf16 operands in HBM, f32 accumulation / recurrent state.
    out_bf, (hn_bf, cn_bf) = jax.block_until_ready(
        encoder_forward(embedded_inputs, input_lengths, params, use_bf16_matmul=True))
    assert float(jnp.max(jnp.abs(out_bf - ref_out))) < 7e-2
    assert float(jnp.max(jnp.abs(hn_bf - ref_hn))) < 7e-2
    assert float(jnp.max(jnp.abs(cn_bf - ref_cn))) < 1e-1
    assert jnp.all(out_bf[1, 5:, :] == 0.0)
    assert jnp.all(jnp.isfinite(out_bf))

    print("KERNEL_OK")
</pallas_src>

<mosaic_0001>
module attributes {stable_mosaic.version = 11 : i64} {
  func.func @_bilstm_step_kernel(%arg0: i32, %arg1: i32, %arg2: memref<2x1xi32, #tpu.memory_space<vmem>>, %arg3: memref<1x2x32xf32, #tpu.memory_space<vmem>>, %arg4: memref<1x32x128xf32, #tpu.memory_space<vmem>>, %arg5: memref<1x32x128xf32, #tpu.memory_space<vmem>>, %arg6: memref<1x1x128xf32, #tpu.memory_space<vmem>>, %arg7: memref<1x1x2x32xf32, #tpu.memory_space<vmem>>, %arg8: memref<1x2x32xf32, #tpu.memory_space<vmem>>, %arg9: memref<1x2x32xf32, #tpu.memory_space<vmem>>, %arg10: memref<2x32xf32, #tpu.memory_space<vmem>>, %arg11: memref<2x32xf32, #tpu.memory_space<vmem>>) attributes {dimension_semantics = [#tpu.dimension_semantics<parallel>, #tpu.dimension_semantics<arbitrary>], iteration_bounds = array<i64: 2, 8>, scalar_prefetch = 0 : i64, scratch_operands = 2 : i64, tpu.core_type = #tpu.core_type<tc>, window_params = [{pipeline_mode = #tpu.pipeline_mode<synchronous>, transform_indices = @transform_0, window_bounds = array<i64: 2, 1>}, {transform_indices = @transform_1, window_bounds = array<i64: 1, 2, 32>}, {transform_indices = @transform_2, window_bounds = array<i64: 1, 32, 128>}, {transform_indices = @transform_3, window_bounds = array<i64: 1, 32, 128>}, {transform_indices = @transform_4, window_bounds = array<i64: 1, 1, 128>}, {transform_indices = @transform_5, window_bounds = array<i64: 1, 1, 2, 32>}, {transform_indices = @transform_6, window_bounds = array<i64: 1, 2, 32>}, {transform_indices = @transform_7, window_bounds = array<i64: 1, 2, 32>}]} {
    %c7_i32 = arith.constant 7 : i32
    %0 = arith.muli %arg0, %c7_i32 : i32
    %1 = arith.addi %0, %arg1 : i32
    %c2_i32 = arith.constant 2 : i32
    %2 = arith.muli %c2_i32, %arg0 : i32
    %3 = arith.muli %2, %arg1 : i32
    %4 = arith.subi %1, %3 : i32
    %c0_i32 = arith.constant 0 : i32
    %5 = arith.cmpi eq, %arg1, %c0_i32 : i32
    %6 = arith.extui %5 : i1 to i32
    %c0_i32_0 = arith.constant 0 : i32
    %7 = arith.cmpi ne, %6, %c0_i32_0 : i32
    scf.if %7 {
      %cst_43 = arith.constant 0.000000e+00 : f32
      %78 = vector.broadcast %cst_43 : f32 to vector<2x32xf32>
      %c0_44 = arith.constant 0 : index
      %c0_45 = arith.constant 0 : index
      %79 = vector.load %arg10[%c0_44, %c0_45] : memref<2x32xf32, #tpu.memory_space<vmem>>, vector<2x32xf32>
      tpu.vector_store %arg10[%c0_44, %c0_45], %78 {strides = array<i32>} : memref<2x32xf32, #tpu.memory_space<vmem>>, vector<2x32xf32>,
      %cst_46 = arith.constant 0.000000e+00 : f32
      %80 = vector.broadcast %cst_46 : f32 to vector<2x32xf32>
      %c0_47 = arith.constant 0 : index
      %c0_48 = arith.constant 0 : index
      %81 = vector.load %arg11[%c0_47, %c0_48] : memref<2x32xf32, #tpu.memory_space<vmem>>, vector<2x32xf32>
      tpu.vector_store %arg11[%c0_47, %c0_48], %80 {strides = array<i32>} : memref<2x32xf32, #tpu.memory_space<vmem>>, vector<2x32xf32>,
    } else {
    }
    %c0 = arith.constant 0 : index
    %c0_1 = arith.constant 0 : index
    %c0_2 = arith.constant 0 : index
    %8 = vector.load %arg3[%c0, %c0_1, %c0_2] : memref<1x2x32xf32, #tpu.memory_space<vmem>>, vector<1x2x32xf32>
    %9 = vector.shape_cast %8 : vector<1x2x32xf32> to vector<2x32xf32>
    %c0_3 = arith.constant 0 : index
    %c0_4 = arith.constant 0 : index
    %c0_5 = arith.constant 0 : index
    %10 = vector.load %arg4[%c0_3, %c0_4, %c0_5] : memref<1x32x128xf32, #tpu.memory_space<vmem>>, vector<1x32x128xf32>
    %11 = vector.shape_cast %10 : vector<1x32x128xf32> to vector<32x128xf32>
    %c0_6 = arith.constant 0 : index
    %c0_7 = arith.constant 0 : index
    %c0_8 = arith.constant 0 : index
    %12 = vector.load %arg5[%c0_6, %c0_7, %c0_8] : memref<1x32x128xf32, #tpu.memory_space<vmem>>, vector<1x32x128xf32>
    %13 = vector.shape_cast %12 : vector<1x32x128xf32> to vector<32x128xf32>
    %c0_9 = arith.constant 0 : index
    %c0_10 = arith.constant 0 : index
    %c0_11 = arith.constant 0 : index
    %14 = vector.load %arg6[%c0_9, %c0_10, %c0_11] : memref<1x1x128xf32, #tpu.memory_space<vmem>>, vector<1x1x128xf32>
    %15 = vector.shape_cast %14 : vector<1x1x128xf32> to vector<1x128xf32>
    %c0_12 = arith.constant 0 : index
    %c0_13 = arith.constant 0 : index
    %16 = vector.load %arg10[%c0_12, %c0_13] : memref<2x32xf32, #tpu.memory_space<vmem>>, vector<2x32xf32>
    %c0_14 = arith.constant 0 : index
    %c0_15 = arith.constant 0 : index
    %17 = vector.load %arg11[%c0_14, %c0_15] : memref<2x32xf32, #tpu.memory_space<vmem>>, vector<2x32xf32>
    %cst = arith.constant dense<0.000000e+00> : vector<2x128xf32>
    %18 = tpu.matmul %9, %11, %cst {dimension_numbers = #tpu.dot_dimension_numbers<[1], [0], [0], [1], [0, 0, 1, 1], [], []>} : vector<2x32xf32>, vector<32x128xf32>, vector<2x128xf32> -> vector<2x128xf32>
    %cst_16 = arith.constant dense<0.000000e+00> : vector<2x128xf32>
    %19 = tpu.matmul %16, %13, %cst_16 {dimension_numbers = #tpu.dot_dimension_numbers<[1], [0], [0], [1], [0, 0, 1, 1], [], []>} : vector<2x32xf32>, vector<32x128xf32>, vector<2x128xf32> -> vector<2x128xf32>
    %20 = arith.addf %18, %19 : vector<2x128xf32>
    %21 = vector.broadcast %15 : vector<1x128xf32> to vector<2x128xf32>
    %22 = arith.addf %20, %21 : vector<2x128xf32>
    %23 = vector.extract_strided_slice %22 {offsets = [0, 0], sizes = [2, 32], strides = [1, 1]} : vector<2x128xf32> to vector<2x32xf32>
    %cst_17 = arith.constant 5.000000e-01 : f32
    %24 = vector.broadcast %cst_17 : f32 to vector<2x32xf32>
    %25 = arith.mulf %24, %23 : vector<2x32xf32>
    %26 = math.tanh %25 : vector<2x32xf32>
    %cst_18 = arith.constant 1.000000e+00 : f32
    %27 = vector.broadcast %cst_18 : f32 to vector<2x32xf32>
    %28 = arith.addf %26, %27 : vector<2x32xf32>
    %cst_19 = arith.constant 5.000000e-01 : f32
    %29 = vector.broadcast %cst_19 : f32 to vector<2x32xf32>
    %30 = arith.mulf %29, %28 : vector<2x32xf32>
    %31 = vector.extract_strided_slice %22 {offsets = [0, 32], sizes = [2, 32], strides = [1, 1]} : vector<2x128xf32> to vector<2x32xf32>
    %cst_20 = arith.constant 5.000000e-01 : f32
    %32 = vector.broadcast %cst_20 : f32 to vector<2x32xf32>
    %33 = arith.mulf %32, %31 : vector<2x32xf32>
    %34 = math.tanh %33 : vector<2x32xf32>
    %cst_21 = arith.constant 1.000000e+00 : f32
    %35 = vector.broadcast %cst_21 : f32 to vector<2x32xf32>
    %36 = arith.addf %34, %35 : vector<2x32xf32>
    %cst_22 = arith.constant 5.000000e-01 : f32
    %37 = vector.broadcast %cst_22 : f32 to vector<2x32xf32>
    %38 = arith.mulf %37, %36 : vector<2x32xf32>
    %39 = vector.extract_strided_slice %22 {offsets = [0, 64], sizes = [2, 32], strides = [1, 1]} : vector<2x128xf32> to vector<2x32xf32>
    %40 = math.tanh %39 : vector<2x32xf32>
    %41 = vector.extract_strided_slice %22 {offsets = [0, 96], sizes = [2, 32], strides = [1, 1]} : vector<2x128xf32> to vector<2x32xf32>
    %cst_23 = arith.constant 5.000000e-01 : f32
    %42 = vector.broadcast %cst_23 : f32 to vector<2x32xf32>
    %43 = arith.mulf %42, %41 : vector<2x32xf32>
    %44 = math.tanh %43 : vector<2x32xf32>
    %cst_24 = arith.constant 1.000000e+00 : f32
    %45 = vector.broadcast %cst_24 : f32 to vector<2x32xf32>
    %46 = arith.addf %44, %45 : vector<2x32xf32>
    %cst_25 = arith.constant 5.000000e-01 : f32
    %47 = vector.broadcast %cst_25 : f32 to vector<2x32xf32>
    %48 = arith.mulf %47, %46 : vector<2x32xf32>
    %49 = arith.mulf %38, %17 : vector<2x32xf32>
    %50 = arith.mulf %30, %40 : vector<2x32xf32>
    %51 = arith.addf %49, %50 : vector<2x32xf32>
    %52 = math.tanh %51 : vector<2x32xf32>
    %53 = arith.mulf %48, %52 : vector<2x32xf32>
    %c0_26 = arith.constant 0 : index
    %c0_27 = arith.constant 0 : index
    %54 = vector.load %arg2[%c0_26, %c0_27] : memref<2x1xi32, #tpu.memory_space<vmem>>, vector<2x1xi32>
    %55 = vector.broadcast %4 : i32 to vector<2x1xi32>
    %56 = arith.cmpi sgt, %54, %55 : vector<2x1xi32>
    %57 = vector.shape_cast %56 : vector<2x1xi1> to vector<2x1xi1>
    %58 = vector.broadcast %57 : vector<2x1xi1> to vector<2x32xi1>
    %59 = arith.select %58, %53, %16 : vector<2x32xi1>, vector<2x32xf32>
    %60 = vector.shape_cast %56 : vector<2x1xi1> to vector<2x1xi1>
    %61 = vector.broadcast %60 : vector<2x1xi1> to vector<2x32xi1>
    %62 = arith.select %61, %51, %17 : vector<2x32xi1>, vector<2x32xf32>
    %c0_28 = arith.constant 0 : index
    %c0_29 = arith.constant 0 : index
    %63 = vector.load %arg10[%c0_28, %c0_29] : memref<2x32xf32, #tpu.memory_space<vmem>>, vector<2x32xf32>
    tpu.vector_store %arg10[%c0_28, %c0_29], %59 {strides = array<i32>} : memref<2x32xf32, #tpu.memory_space<vmem>>, vector<2x32xf32>,
    %c0_30 = arith.constant 0 : index
    %c0_31 = arith.constant 0 : index
    %64 = vector.load %arg11[%c0_30, %c0_31] : memref<2x32xf32, #tpu.memory_space<vmem>>, vector<2x32xf32>
    tpu.vector_store %arg11[%c0_30, %c0_31], %62 {strides = array<i32>} : memref<2x32xf32, #tpu.memory_space<vmem>>, vector<2x32xf32>,
    %cst_32 = arith.constant 0.000000e+00 : f32
    %65 = vector.shape_cast %56 : vector<2x1xi1> to vector<2x1xi1>
    %66 = vector.broadcast %65 : vector<2x1xi1> to vector<2x32xi1>
    %67 = vector.broadcast %cst_32 : f32 to vector<2x32xf32>
    %68 = arith.select %66, %53, %67 : vector<2x32xi1>, vector<2x32xf32>
    %c0_33 = arith.constant 0 : index
    %c0_34 = arith.constant 0 : index
    %c0_35 = arith.constant 0 : index
    %c0_36 = arith.constant 0 : index
    %69 = vector.load %arg7[%c0_33, %c0_34, %c0_35, %c0_36] : memref<1x1x2x32xf32, #tpu.memory_space<vmem>>, vector<1x1x2x32xf32>
    %70 = vector.shape_cast %69 : vector<1x1x2x32xf32> to vector<2x32xf32>
    %71 = vector.shape_cast %68 : vector<2x32xf32> to vector<1x1x2x32xf32>
    tpu.vector_store %arg7[%c0_33, %c0_34, %c0_35, %c0_36], %71 {strides = array<i32>} : memref<1x1x2x32xf32, #tpu.memory_space<vmem>>, vector<1x1x2x32xf32>,
    %c0_37 = arith.constant 0 : index
    %c0_38 = arith.constant 0 : index
    %c0_39 = arith.constant 0 : index
    %72 = vector.load %arg8[%c0_37, %c0_38, %c0_39] : memref<1x2x32xf32, #tpu.memory_space<vmem>>, vector<1x2x32xf32>
    %73 = vector.shape_cast %72 : vector<1x2x32xf32> to vector<2x32xf32>
    %74 = vector.shape_cast %59 : vector<2x32xf32> to vector<1x2x32xf32>
    tpu.vector_store %arg8[%c0_37, %c0_38, %c0_39], %74 {strides = array<i32>} : memref<1x2x32xf32, #tpu.memory_space<vmem>>, vector<1x2x32xf32>,
    %c0_40 = arith.constant 0 : index
    %c0_41 = arith.constant 0 : index
    %c0_42 = arith.constant 0 : index
    %75 = vector.load %arg9[%c0_40, %c0_41, %c0_42] : memref<1x2x32xf32, #tpu.memory_space<vmem>>, vector<1x2x32xf32>
    %76 = vector.shape_cast %75 : vector<1x2x32xf32> to vector<2x32xf32>
    %77 = vector.shape_cast %62 : vector<2x32xf32> to vector<1x2x32xf32>
    tpu.vector_store %arg9[%c0_40, %c0_41, %c0_42], %77 {strides = array<i32>} : memref<1x2x32xf32, #tpu.memory_space<vmem>>, vector<1x2x32xf32>,
    return
  }
  func.func @transform_0(%arg0: i32, %arg1: i32) -> (i32, i32) {
    %c0_i32 = arith.constant 0 : i32
    %c0_i32_0 = arith.constant 0 : i32
    %c0_i32_1 = arith.constant 0 : i32
    return %c0_i32, %c0_i32_0 : i32, i32
  }
  func.func @transform_1(%arg0: i32, %arg1: i32) -> (i32, i32, i32) {
    %c7_i32 = arith.constant 7 : i32
    %0 = arith.muli %arg0, %c7_i32 : i32
    %1 = arith.addi %0, %arg1 : i32
    %c2_i32 = arith.constant 2 : i32
    %2 = arith.muli %c2_i32, %arg0 : i32
    %3 = arith.muli %2, %arg1 : i32
    %4 = arith.subi %1, %3 : i32
    %c0_i32 = arith.constant 0 : i32
    %c0_i32_0 = arith.constant 0 : i32
    %c0_i32_1 = arith.constant 0 : i32
    return %4, %c0_i32, %c0_i32_0 : i32, i32, i32
  }
  func.func @transform_2(%arg0: i32, %arg1: i32) -> (i32, i32, i32) {
    %c0_i32 = arith.constant 0 : i32
    %c0_i32_0 = arith.constant 0 : i32
    %c0_i32_1 = arith.constant 0 : i32
    return %arg0, %c0_i32, %c0_i32_0 : i32, i32, i32
  }
  func.func @transform_3(%arg0: i32, %arg1: i32) -> (i32, i32, i32) {
    %c0_i32 = arith.constant 0 : i32
    %c0_i32_0 = arith.constant 0 : i32
    %c0_i32_1 = arith.constant 0 : i32
    return %arg0, %c0_i32, %c0_i32_0 : i32, i32, i32
  }
  func.func @transform_4(%arg0: i32, %arg1: i32) -> (i32, i32, i32) {
    %c0_i32 = arith.constant 0 : i32
    %c0_i32_0 = arith.constant 0 : i32
    %c0_i32_1 = arith.constant 0 : i32
    return %arg0, %c0_i32, %c0_i32_0 : i32, i32, i32
  }
  func.func @transform_5(%arg0: i32, %arg1: i32) -> (i32, i32, i32, i32) {
    %c7_i32 = arith.constant 7 : i32
    %0 = arith.muli %arg0, %c7_i32 : i32
    %1 = arith.addi %0, %arg1 : i32
    %c2_i32 = arith.constant 2 : i32
    %2 = arith.muli %c2_i32, %arg0 : i32
    %3 = arith.muli %2, %arg1 : i32
    %4 = arith.subi %1, %3 : i32
    %c0_i32 = arith.constant 0 : i32
    %c0_i32_0 = arith.constant 0 : i32
    %c0_i32_1 = arith.constant 0 : i32
    return %arg0, %4, %c0_i32, %c0_i32_0 : i32, i32, i32, i32
  }
  func.func @transform_6(%arg0: i32, %arg1: i32) -> (i32, i32, i32) {
    %c0_i32 = arith.constant 0 : i32
    %c0_i32_0 = arith.constant 0 : i32
    %c0_i32_1 = arith.constant 0 : i32
    return %arg0, %c0_i32, %c0_i32_0 : i32, i32, i32
  }
  func.func @transform_7(%arg0: i32, %arg1: i32) -> (i32, i32, i32) {
    %c0_i32 = arith.constant 0 : i32
    %c0_i32_0 = arith.constant 0 : i32
    %c0_i32_1 = arith.constant 0 : i32
    return %arg0, %c0_i32, %c0_i32_0 : i32, i32, i32
  }
}

</mosaic_0001>

<bundles_post_ra>
// kernel: tpu_custom_call.1
= control target key start
LH: loop header
LB: loop body
LE: loop exit
PB: predicated region body
PF: predicated region fallthrough
CT: control target
= control target key end

     0   :  { %s2089_s0 = inlined_call_operand.vmem [shape: s32[2,1], index: 0, kind: input, shape index: {}]   ;;  %s2090_s1 = inlined_call_operand.hbm [shape: f32[8,2,32], index: 1, kind: input, shape index: {}]   ;;  %s2091_s2 = inlined_call_operand.hbm [shape: f32[2,32,128], index: 2, kind: input, shape index: {}]   ;;  %s2092_s3 = inlined_call_operand.hbm [shape: f32[2,32,128], index: 3, kind: input, shape index: {}]   ;;  %s2093_s4 = inlined_call_operand.vmem [shape: f32[2,1,128], index: 4, kind: input, shape index: {}]   ;;  %s2094_s5 = inlined_call_operand.hbm [shape: f32[2,8,2,32], index: 5, kind: output, shape index: {0}]   ;;  %s2095_s6 = inlined_call_operand.hbm [shape: f32[2,2,32], index: 6, kind: output, shape index: {1}]   ;;  %s2096_s7 = inlined_call_operand.hbm [shape: f32[2,2,32], index: 7, kind: output, shape index: {2}]  }
   0x1   :  { %2123 = sst [smem:[#allocation30_spill]] %s2089_s0 }
   0x2   :  { %2124 = sst [smem:[#allocation31_spill]] %s2090_s1 }
   0x3   :  { %2125 = sst [smem:[#allocation32_spill]] %s2091_s2 }
   0x4   :  { %2126 = sst [smem:[#allocation33_spill]] %s2092_s3 }
   0x5   :  { %2127 = sst [smem:[#allocation34_spill]] %s2093_s4 }
   0x6   :  { %2128 = sst [smem:[#allocation35_spill]] %s2094_s5 }
   0x7   :  { %2129 = sst [smem:[#allocation36_spill]] %s2095_s6 }
   0x8   :  { %2130 = sst [smem:[#allocation37_spill]] %s2096_s7 }
   0x9   :  { %13 = vsyncpa [#allocation5], 0 }
   0xa   :  { %15 = vsyncpa [#allocation5 + $0x1], 0 }
   0xb   :  { %16 = vsyncpa [#allocation8], 0 }
   0xc   :  { %18 = vsyncpa [#allocation8 + $0x1], 0 }
   0xd   :  { %19 = vsyncpa [#allocation6], 0 }
   0xe   :  { %21 = vsyncpa [#allocation6 + $0x1], 0 }
   0xf   :  { %22 = vsyncpa [#allocation12], 0 }
  0x10   :  { %24 = vsyncpa [#allocation12 + $0x1], 0  ;;  %s1548_s24 = smov 0   ;;  %s1550_s25 = smov 0  }
  0x11   :  { %s1552_s26 = smov 0   ;;  %s1554_s27 = smov 0  }
  0x12   :  { %s1556_s28 = smov 0   ;;  %s1558_s29 = smov 0  }
  0x13   :  { %s1560_s30 = smov 0   ;;  %s1562_s8 = smov 0  }
  0x14   :  { %s1564_s9 = smov 0   ;;  %s1566_s10 = smov 0  }
  0x15   :  { %s1568_s11 = smov 0   ;;  %s1570_s12 = smov 0  }
  0x16   :  { %s1572_s13 = smov 0   ;;  %s1574_s14 = smov 0  }
  0x17 LB: > { %2131 = sst [smem:[#allocation18_spill]] %s1446_s26  ;;  %p88_p0 = scmp.eq.s32.totalorder %s1490_s14, 0  ;;  %s1490_s14 = sphi %s1574_s14, %s30_s14   ;;  %s1486_s13 = sphi %s1572_s13, %s2198_s13   ;;  %s1482_s12 = sphi %s1570_s12, %s2197_s12   ;;  %s1478_s11 = sphi %s1568_s11, %s2196_s11   ;;  %s1474_s10 = sphi %s1566_s10, %s2195_s10   ;;  %s1470_s9 = sphi %s1564_s9, %s2204_s9   ;;  %s1466_s8 = sphi %s1562_s8, %s2203_s8   ;;  %s1462_s30 = sphi %s1560_s30, %s2193_s30   ;;  %s1458_s29 = sphi %s1558_s29, %s2192_s29   ;;  %s1454_s28 = sphi %s1556_s28, %s2202_s28   ;;  %s1450_s27 = sphi %s1554_s27, %s2201_s27   ;;  %s1446_s26 = sphi %s1552_s26, %s2190_s26   ;;  %s1442_s25 = sphi %s1550_s25, %s2200_s25   ;;  %s1438_s24 = sphi %s1548_s24, %s2199_s24  }
  0x18   : > { %2132 = sst [smem:[#allocation19_spill]] %s1458_s29  ;;  %p2102_p1 = scmp.ne.s32.totalorder %s1458_s29, %s1454_s28 }
  0x19   : > { %2133 = sst [smem:[#allocation20_spill]] %s1466_s8  ;;  %p2101_p4 = scmp.lt.s32.totalorder %s1490_s14, 16 }
  0x1a   : > { %2134 = sst [smem:[#allocation21_spill]] %s1474_s10  ;;  %p115_p3 = por %p2102_p1, %p88_p0 }
  0x1b   : > { %2135 = sst [smem:[#allocation22_spill]] %s1478_s11  ;;  %s311_s15 = sand.u32 1, %s1490_s14  }
  0x1c   : > { %2136 = sst [smem:[#allocation23_spill]] %s1482_s12  ;;  %s313_s16 = sand.u32 1, %s1458_s29  }
  0x1d   : > { %2137 = sst [smem:[#allocation24_spill]] %s1486_s13  ;;  %s1631_s17 = sshll.u32 %s313_s16, 5 }
  0x1e   : > { %s2098_s18 = sshll.u32 %s1486_s13, 9  ;;  %s2138_s2 = sld [smem:[#allocation32_spill]] }
  0x1f   : > { %s315_s22 = scalar_lea.vmem [#allocation7], %s1631_s17  ;;  %p1646_p5 = pnand %p2101_p4, %p115_p3 }
  0x20   : > { %s322_s23 = sshll.u32 %s315_s22, 4  ;;  %s1650_s5 = scalar_lea.sflag [#allocation8], %s311_s15  ;;  %s1642_s23 = int_to_ptr.vmem [resolvable:$true] %s322_s23 }
  0x21   : > { %p2112_p7 = pneg %p1646_p5 }
  0x24   : > { %s1639_s21 = scalar_lea.hbm %s2138_s2, %s2098_s18  ;;  %s1195_s18 = scalar_lea.hbm %s2138_s2, 1024 }
  0x25   : > { %s1190_s19 = scalar_lea.hbm %s1639_s21, 512  ;;  %p1196_p10 = scmp.lt.u32.totalorder %s1639_s21, %s2138_s2 }
  0x26   : > { %p1191_p6 = scmp.ne.s32.totalorder %s1639_s21, %s1190_s19  ;;  %p1197_p11 = scmp.lt.u32.totalorder %s1195_s18, %s1190_s19 }
  0x27   : > { %p1199_p13 = scmp.lt.u32.totalorder %s1190_s19, %s1639_s21 }
  0x28   : > { %p1193_p8 = pnand %p2112_p7, %p1191_p6  ;;  %p1198_p12 = por %p1197_p11, %p1196_p10 }
  0x2a   : > { %p1194_p9 = pneg %p1193_p8  ;;  %p1200_p3 = por %p1199_p13, %p1198_p12 }
  0x2c   : > { %p1201_p4 = pnand %p1200_p3, %p1194_p9 }
  0x2e   : > { %1204 = shalt.err (!%p1201_p4)
}
  0x2f   : > { %s1205_s15 = scalar_lea.vmem %s1642_s23, 512  ;;  %s1492_s20 = smov [#allocation7]  }
  0x30   : > { %p1206_p6 = scmp.ne.s32.totalorder %s1642_s23, %s1205_s15  ;;  %s1210_s22 = sshll.u32 %s1492_s20, 4  ;;  %s1211_s22 = int_to_ptr.vmem [resolvable:$false] %s1210_s22 }
  0x31   : > { %s1212_s6 = scalar_lea.vmem %s1211_s22, 1024  ;;  %p1213_p2 = scmp.lt.s32.totalorder %s1642_s23, %s1211_s22 }
  0x32   : > { %p1208_p8 = pnand %p1206_p6, %p2112_p7  ;;  %p1214_p10 = scmp.lt.s32.totalorder %s1212_s6, %s1205_s15 }
  0x34   : > { %p1209_p1 = pneg %p1208_p8  ;;  %p1215_p11 = por %p1214_p10, %p1213_p2 }
  0x36   : > { %p1216_p12 = pnand %p1215_p11, %p1209_p1 }
  0x38   : > { %1219 = shalt.err (!%p1216_p12)
}
  0x39   : > { %s2103_s7 = smov 128   ;;  %s2104_s18 = smov 8  }
  0x3a   : > { %1044 = dma.hbm_to_vmem [thread:$0]  (!%p1646_p5), %s1639_s21, 512, %s1642_s23, %s1650_s5, %s2103_s7, %s2103_s7, %s2104_s18  }
  0x3b   : > { %s2140_s19 = sshll.u32 %s1486_s13, 9  ;;  %s2141_s3 = sld [smem:[#allocation33_spill]] }
  0x3c   : > { %s336_s6 = scalar_lea.vmem [#allocation9], %s1631_s17  ;;  %p958_p1 = scmp.ge.s32.totalorder %s1490_s14, 1 }
  0x3d   : > { %s343_s2 = sshll.u32 %s336_s6, 4  ;;  %p357_p2 = scmp.lt.s32.totalorder %s1490_s14, 17  ;;  %s1689_s2 = int_to_ptr.vmem [resolvable:$true] %s343_s2 }
  0x3e   : > { %s1698_s21 = sadd.s32 4294967295, %s1490_s14   ;;  %s39_s17 = sadd.s32 1, %s1482_s12 }
  0x3f   : > { %p1693_p4 = pnand %p958_p1, %p357_p2  ;;  %p40_p9 = scmp.ge.s32.totalorder %s39_s17, 8 }
  0x40   : > { %s67_s15 = smul.u32 7, %s1486_s13  ;;  %s943_s20 = sshll.u32 %s1486_s13, 1 }
  0x41   : > { %s1686_s22 = scalar_lea.hbm %s2141_s3, %s2140_s19  ;;  %s42_s19 = sadd.s32 1, %s1486_s13 }
  0x42   : > { %s2142_s0 = scalar_select %p1693_p4, 1, 0 }
  0x43   : > { %s80_s6 = sadd.s32 1, %s1470_s9  ;;  %s2206_s17 = smov (%p40_p9, %s39_s17), 0 }
  0x44   : > { %2143 = sst [smem:[#allocation25_spill]] %s2206_s17  ;;  %s2208_s19 = smov (!%p40_p9, %s42_s19), %s1486_s13 }
  0x45   : > { %s68_s7 = sadd.s32 %s1482_s12, %s67_s15  ;;  %s70_s18 = smul.u32 %s1482_s12, %s943_s20 }
  0x46   : > { %p44_p13 = scmp.ge.s32.totalorder %s2208_s19, 2  ;;  %p87_p3 = scmp.ne.s32.totalorder %s1470_s9, %s1466_s8 }
  0x47   : > { %s1713_s23 = ssub.s32 %s68_s7, %s70_s18  ;;  %p93_p6 = scmp.ne.s32.totalorder %s1466_s8, %s1462_s30 }
  0x48   : > { %s2210_s19 = smov (%p44_p13, %s2208_s19), 0  ;;  %p1721_p8 = por %p88_p0, %p87_p3 }
  0x49   : > { %2144 = sst [smem:[#allocation26_spill]] %s2210_s19  ;;  %p94_p10 = scmp.eq.s32.totalorder %s1698_s21, 0 }
  0x4a   : > { %s72_s7 = smul.u32 7, %s2210_s19  ;;  %s944_s18 = sshll.u32 %s2210_s19, 1 }
  0x4b   : > { %s75_s20 = smul.u32 %s944_s18, %s2206_s17  ;;  %p1729_p11 = por %p94_p10, %p93_p6 }
  0x4c   : > { %s73_s12 = sadd.s32 %s72_s7, %s2206_s17  ;;  %s103_s4 = ssub.s32 %s1486_s13, %s2210_s19 }
  0x4d   : > { %s2146_s30 = scalar_select %p1729_p11, 1, 0 }
  0x4e   : > { %s76_s10 = ssub.s32 %s73_s12, %s75_s20  ;;  %p104_p0 = scmp.eq.s32.totalorder %s103_s4, 0 }
  0x4f   : > { %s77_s11 = ssub.s32 %s1713_s23, %s76_s10  ;;  %s106_s8 = sadd.s32 1, %s1458_s29 }
  0x50   : > { %p78_p12 = scmp.eq.s32.totalorder %s77_s11, 0  ;;  %p2147_p1 = scmp.ne.s32.totalorder %s1454_s28, %s1450_s27 }
  0x51   : > { %s1746_s7 = scalar_select %p104_p0, %s1458_s29, %s106_s8  }
  0x52   : > { %p1741_p2 = por %p2147_p1, %p94_p10  ;;  %s193_s20 = sor.u32 %s103_s4, %s77_s11 }
  0x53   : > { %2149 = sst [smem:[#allocation27_spill]] %s1746_s7  ;;  %s196_s19 = sadd.s32 1, %s1446_s26 }
  0x54   : > { %s2148_s18 = scalar_select %p1741_p2, 1, 0 }
  0x55   : > { %s1749_s12 = scalar_select %p78_p12, %s1470_s9, %s80_s6  }
  0x56   : > { %p194_p9 = scmp.eq.s32.totalorder %s193_s20, 0  ;;  %p206_p13 = scmp.ne.s32.totalorder %s1446_s26, %s1442_s25 }
  0x57   : > { %2150 = sst [smem:[#allocation28_spill]] %s1749_s12  ;;  %p207_p3 = scmp.eq.s32.totalorder %s1698_s21, 15 }
  0x58   : > { %p212_p6 = scmp.ne.s32.totalorder %s1442_s25, %s1438_s24  ;;  %s2153_s8 = sadd.s32 4294967294, %s1490_s14  }
  0x59   : > { %s1758_s10 = scalar_select %p194_p9, %s1446_s26, %s196_s19  }
  0x5a   : > { %p1760_p10 = por %p207_p3, %p206_p13  ;;  %p213_p0 = scmp.eq.s32.totalorder %s2153_s8, 15 }
  0x5b   : > { %2151 = sst [smem:[#allocation29_spill]] %s1758_s10  ;;  %p2154_p12 = scmp.ne.s32.totalorder %s1458_s29, %s1454_s28 }
  0x5c   : > { %s2152_s17 = scalar_select %p1760_p10, 1, 0 }
  0x5d   : > { %p1769_p1 = por %p207_p3, %p2154_p12  ;;  %s288_s11 = sand.u32 1, %s1470_s9  }
  0x5e   : > { %p1774_p7 = por %p213_p0, %p212_p6  ;;  %p2157_p9 = scmp.ne.s32.totalorder %s1454_s28, %s1450_s27 }
  0x5f   : > { %s2155_s4 = scalar_select %p1769_p1, 1, 0 }
  0x60   : > { %s2156_s6 = scalar_select %p1774_p7, 1, 0 }
  0x61   : > { %p1781_p2 = por %p213_p0, %p2157_p9  ;;  %s949_s20 = sshll.u32 %s288_s11, 1 }
  0x62   : > { %s951_s8 = sshll.u32 %s1713_s23, 5  ;;  %s2159_s1 = sld [smem:[#allocation31_spill]] }
  0x63   : > { %s2158_s19 = scalar_select %p1781_p2, 1, 0 }
  0x64   : > { %s292_s29 = scalar_lea.vmem [#allocation4], %s949_s20  ;;  %p2160_p13 = scmp.lt.s32.totalorder %s1490_s14, 16 }
  0x65   : > { %s304_s10 = sshll.u32 %s292_s29, 4  ;;  %s1220_s26 = scalar_lea.hbm %s1686_s22, 512  ;;  %s1793_s10 = int_to_ptr.vmem [resolvable:$true] %s304_s10 }
  0x66   : > { %p1799_p3 = pnand %p2160_p13, %p1721_p8  ;;  %p1221_p6 = scmp.ne.s32.totalorder %s1686_s22, %s1220_s26 }
  0x67   : > { %p2162_p0 = pneg %p1646_p5  ;;  %s1225_s12 = scalar_lea.hbm %s2141_s3, 1024 }
  0x68   : > { %s1791_s7 = scalar_lea.hbm %s2159_s1, %s951_s8  ;;  %p1226_p2 = scmp.lt.u32.totalorder %s1686_s22, %s2141_s3 }
  0x69   : > { %p1223_p12 = pnand %p1221_p6, %p2162_p0  ;;  %p1227_p7 = scmp.lt.u32.totalorder %s1225_s12, %s1220_s26 }
  0x6a   : > { %p1229_p8 = scmp.lt.u32.totalorder %s1220_s26, %s1686_s22 }
  0x6b   : > { %p1224_p9 = pneg %p1223_p12  ;;  %p1228_p10 = por %p1227_p7, %p1226_p2 }
  0x6d   : > { %p1230_p13 = por %p1229_p8, %p1228_p10 }
  0x6f   : > { %p1231_p1 = pnand %p1230_p13, %p1224_p9 }
  0x71   : > { %1234 = shalt.err (!%p1231_p1)
}
  0x72   : > { %s1235_s15 = scalar_lea.vmem %s1689_s2, 512  ;;  %s1495_s8 = smov [#allocation9]  }
  0x73   : > { %p1236_p6 = scmp.ne.s32.totalorder %s1689_s2, %s1235_s15  ;;  %s1240_s23 = sshll.u32 %s1495_s8, 4  ;;  %s1241_s23 = int_to_ptr.vmem [resolvable:$false] %s1240_s23 }
  0x74   : > { %s1242_s13 = scalar_lea.vmem %s1241_s23, 1024  ;;  %p1243_p4 = scmp.lt.s32.totalorder %s1689_s2, %s1241_s23 }
  0x75   : > { %p1238_p12 = pnand %p1236_p6, %p2162_p0  ;;  %p1244_p7 = scmp.lt.s32.totalorder %s1242_s13, %s1235_s15 }
  0x77   : > { %p1239_p11 = pneg %p1238_p12  ;;  %p1245_p2 = por %p1244_p7, %p1243_p4 }
  0x79   : > { %p1246_p10 = pnand %p1245_p2, %p1239_p11 }
  0x7b   : > { %1249 = shalt.err (!%p1246_p10)
}
  0x7c   : > { %s2163_s26 = smov 8   ;;  %s2164_s12 = smov 128  }
  0x7d   : > { %1047 = dma.hbm_to_vmem [thread:$0]  (!%p1646_p5), %s1686_s22, 512, %s1689_s2, %s1650_s5, %s2164_s12, %s2164_s12, %s2163_s26  }
  0x7e   : > { %s289_s20 = scalar_lea.sflag [#allocation5], %s288_s11  ;;  %s1250_s29 = scalar_lea.hbm %s1791_s7, 32 }
  0x7f   : > { %p1251_p4 = scmp.ne.s32.totalorder %s1791_s7, %s1250_s29  ;;  %p1252_p11 = pneg %p1799_p3 }
  0x80   : > { %s1255_s8 = scalar_lea.hbm %s2159_s1, 256  ;;  %p1256_p8 = scmp.lt.u32.totalorder %s1791_s7, %s2159_s1 }
  0x81   : > { %p1253_p1 = pnand %p1252_p11, %p1251_p4  ;;  %p1257_p13 = scmp.lt.u32.totalorder %s1255_s8, %s1250_s29 }
  0x82   : > { %p1259_p6 = scmp.lt.u32.totalorder %s1250_s29, %s1791_s7 }
  0x83   : > { %p1254_p9 = pneg %p1253_p1  ;;  %p1258_p5 = por %p1257_p13, %p1256_p8 }
  0x85   : > { %p1260_p0 = por %p1259_p6, %p1258_p5 }
  0x87   : > { %p1261_p12 = pnand %p1260_p0, %p1254_p9 }
  0x89   : > { %1264 = shalt.err (!%p1261_p12)
}
  0x8a   : > { %s1265_s2 = scalar_lea.vmem %s1793_s10, 32  ;;  %s1496_s5 = smov [#allocation4]  }
  0x8b   : > { %p1266_p7 = scmp.ne.s32.totalorder %s1793_s10, %s1265_s2  ;;  %s1270_s22 = sshll.u32 %s1496_s5, 4  ;;  %s1271_s22 = int_to_ptr.vmem [resolvable:$false] %s1270_s22 }
  0x8c   : > { %s1272_s11 = scalar_lea.vmem %s1271_s22, 64  ;;  %p1273_p4 = scmp.lt.s32.totalorder %s1793_s10, %s1271_s22 }
  0x8d   : > { %p1268_p2 = pnand %p1266_p7, %p1252_p11  ;;  %p1274_p1 = scmp.lt.s32.totalorder %s1272_s11, %s1265_s2 }
  0x8f   : > { %p1269_p10 = pneg %p1268_p2  ;;  %p1275_p8 = por %p1274_p1, %p1273_p4 }
  0x91   : > { %p1276_p13 = pnand %p1275_p8, %p1269_p10 }
  0x93   : > { %1279 = shalt.err (!%p1276_p13)
}
  0x94   : > { %1041 = dma.hbm_to_vmem [thread:$0]  (!%p1799_p3), %s1791_s7, 32, %s1793_s10, %s289_s20  }
  0x95   : > { %p2165_p9 = scmp.ne.s32.totalorder %s2142_s0, 0 }
  0x96   : > { %s2166_s26 = sld [smem:[#allocation20_spill]] (!%p2165_p9)  ;;  %p2167_p11 = scmp.ne.s32.totalorder (!%p2165_p9), %s2146_s30, 0 }
  0x97   : > { %361 = sbr.rel (%p2165_p9) target bundleno = 958 (0x3be), region = 40 }
  0x9c   : > { %s363_s12 = sand.u32 (!%p2165_p9), 1, %s2166_s26  }
  0x9d   : > { %s1860_s29 = sshll.u32 (!%p2165_p9), %s363_s12, 1  ;;  %s364_s16 = scalar_lea.sflag (!%p2165_p9), [#allocation5], %s363_s12 }
  0x9e   : > { %1421 = dma.done.wait (%p2167_p11), %s364_s16, 32  }
  0x9f   : > { %1423 = vsyncadd (%p2167_p11), %s364_s16, 4294967264  ;;  %s2120_s7 = sand.u32 1, %s1698_s21   ;;  %s374_s0 = sand.u32 1, %s1454_s28  }
  0xa0   : > { %s960_s10 = sshll.u32 %s374_s0, 5  ;;  %s373_s27 = scalar_lea.sflag [#allocation8], %s2120_s7 }
  0xa1   : > { %s1871_s20 = scalar_lea.vmem [#allocation7], %s960_s10  ;;  %p2168_p3 = scmp.ne.s32.totalorder %s2148_s18, 0 }
  0xa3   : > { %1425 = dma.done.wait (%p2168_p3), %s373_s27, 1024  }
  0xa4   : > { %1427 = vsyncadd (%p2168_p3), %s373_s27, 4294966272  ;;  %s2169_s30 = sld [smem:[#allocation22_spill]]  ;;  %s2170_s8 = sld [smem:[#allocation21_spill]] }
  0xa5   : > { %s2121_s23 = sand.u32 1, %s1442_s25   ;;  %s1882_s2 = sshll.u32 %s374_s0, 1 }
  0xa6   : > { %s1880_s13 = sshll.u32 %s2121_s23, 1  ;;  %s2171_s16 = sld [smem:[#allocation34_spill]] }
  0xa7   : > { %s385_s23 = scalar_lea.vmem [#allocation9], %s960_s10  ;;  %s2122_s15 = scalar_lea.vmem [#allocation10], %s1880_s13 }
  0xa8   : > { %s431_s0 = scalar_lea.vmem [#allocation11], %s1882_s2  ;;  %s438_s1 = scalar_lea.vmem [#allocation13], %s1882_s2 }
  0xaa   : > { %p444_p5 = scmp.lt.s32.totalorder %s2169_s30, 1  ;;  %s452_s18 = smul.u32 7, %s2169_s30 }
  0xab   : > { %s965_s5 = sshll.u32 %s2169_s30, 1  ;;  %p966_p6 = scmp.ne.s32.totalorder %s2170_s8, 0 }
  0xac   : > { %s2212_s30 = smov (!%p444_p5, %s2169_s30), 1  ;;  %s453_s22 = sadd.s32 %s2170_s8, %s452_s18  ;;  %vm461_vm0 = vcmask (!%p966_p6), 254976   ;;  %v1497_v0 = vmov (!%p966_p6), 0.0  }
  0xad   : > { %s455_s11 = smul.u32 %s2170_s8, %s965_s5  ;;  %s446_s27 = scalar_lea.vmem %s2171_s16, %s2212_s30  ;;  %462 = vst.msk [vmem:[#allocation2] sm:$0x3] (!%p966_p6), %vm461_vm0, %v1497_v0  ;;  %463 = vst.msk [vmem:[#allocation3] sm:$0x3] (!%p966_p6), %vm461_vm0, %v1497_v0 }
  0xae   : > { %460 = sbr.rel (%p966_p6) target bundleno = 181 (0xb5), region = 56 }
  0xaf   : > { %s1896_s7 = ssub.s32 %s453_s22, %s455_s11 }
  0xb5 PF: > { %v469_v1 = vld [vmem:[%s385_s23] sm:$0xff]  ;;  %v470_v2 = vld [vmem:[%s385_s23 + $0x8] sm:$0xff]  ;;  %v1498_v4 = vmov 0.0|0.0   ;;  %v471_v7 = vld [vmem:[%s385_s23 + $0x10] sm:$0xff]  ;;  %vm1499_vm1 = vmmov 0   ;;  %v1500_v12 = vmov 0.0   ;;  %v657_v31 = vstv %s1896_s7 }
  0xb6   : > { %v465_v3 = vld [vmem:[%s1871_s20] sm:$0xff]  ;;  %1014 = vmatprep.subr.bf16.mxu0 %v1498_v4  ;;  %1020 = vmatprep.subr.bf16.mxu1 %v1498_v4  ;;  %v1015_v5 = vpack.c.bf16 %v470_v2, %v469_v1  ;;  %v466_v6 = vld [vmem:[%s1871_s20 + $0x8] sm:$0xff]  ;;  %v472_v8 = vld [vmem:[%s385_s23 + $0x18] sm:$0xff]  ;;  %vm476_vm2 = vcmask 261120   ;;  %s2172_s10 = scalar_lea.vmem [#allocation4], %s1860_s29  ;;  %v1501_v24 = vmov 0  }
  0xb7   : > { %v1021_v9 = vpack.c.bf16 %v466_v6, %v465_v3  ;;  %v467_v10 = vld [vmem:[%s1871_s20 + $0x10] sm:$0xff]  ;;  %v468_v11 = vld [vmem:[%s1871_s20 + $0x18] sm:$0xff]  ;;  %1000 = vmatprep.mubr.msk.f32.mxu0 %vm1499_vm1, %v1500_v12  ;;  %1011 = vmatprep.mubr.msk.f32.mxu1 %vm1499_vm1, %v1500_v12  ;;  %v1018_v13 = vpack.c.bf16 %v472_v8, %v471_v7  ;;  %s1502_s29 = smov 64   ;;  %s1503_s18 = smov 32   ;;  %vm673_vm5 = vcmask 254976  }
  0xb8   : > { %1016 = vmatpush3.bf16.msra.mxu0 %v1015_v5  ;;  %v1024_v14 = vpack.c.bf16 %v468_v11, %v467_v10  ;;  %v474_v15 = vld [vmem:[#allocation2] sm:$0x3]  ;;  %v464_v16 = vld [vmem:[%s2172_s10] sm:$0x3]  ;;  %1182 = vset.pattern.permute.xlu1 %v1501_v24  ;;  %v475_v26 = vld [vmem:[#allocation3] sm:$0x3] }
  0xb9   : > { %1022 = vmatpush3.bf16.msra.mxu1 %v1021_v9  ;;  %1017 = vmatprep.subr.bf16.mxu0 %v1498_v4  ;;  %v969_v18 = vld [vmem:[%s446_s27] ss:$0 sm:$0xff]  ;;  %s2174_s22 = sld [smem:[#allocation30_spill]]  ;;  %s1504_s11 = smov 96  }
  0xba   : > { %1023 = vmatprep.subr.bf16.mxu1 %v1498_v4  ;;  %1183 = vset.pattern.permute.xlu0 %v1501_v24  ;;  %s2175_s26 = sld [smem:[#allocation22_spill]]  ;;  %s732_s10 = sshll.u32 %s431_s0, 4  ;;  %s1939_s10 = int_to_ptr.vmem [resolvable:$true] %s732_s10 }
  0xbb   : > { %s2176_s23 = sld [smem:[#allocation36_spill]]  ;;  %s745_s30 = sshll.u32 %s438_s1, 4  ;;  %s1946_s30 = int_to_ptr.vmem [resolvable:$true] %s745_s30 }
  0xbc   : > { %1019 = vmatpush3.bf16.msra.mxu0 %v1018_v13  ;;  %s2177_s3 = sld [smem:[#allocation37_spill]]  ;;  %s2180_s8 = sand.u32 1, %s1698_s21  }
  0xbd   : > { %1025 = vmatpush3.bf16.msra.mxu1 %v1024_v14  ;;  %p2181_p12 = scmp.ne.s32.totalorder %s2155_s4, 0 }
  0xbf   : > { %1001 = vmatmul.mubr.msk.f32.vlgmr.msra.gmra.mrb[0].mxu0 %vm476_vm2, %v474_v15  ;;  %v656_v30 = vld [vmem:[%s2174_s22] sm:$0x3]  ;;  %s719_s22 = sshll.u32 %s2122_s15, 4  ;;  %s1957_s22 = int_to_ptr.vmem [resolvable:$true] %s719_s22 }
  0xc0   : > { %1012 = vmatmul.mubr.msk.f32.vlgmr.msra.gmra.mrb[0].mxu1 %vm476_vm2, %v464_v16  ;;  %vm658_vm3 = vcmp.gt.s32.totalorder %v656_v30, %v657_v31  ;;  %s974_s12 = sshll.u32 %s2175_s26, 3  ;;  %s976_s16 = sshll.u32 %s2175_s26, 5 }
  0xc1   : > { %v659_v35 = vsel %vm658_vm3, 1, %v1501_v24  ;;  %s715_s27 = sadd.s32 %s974_s12, %s1896_s7  ;;  %s2178_s12 = sld [smem:[#allocation35_spill]] }
  0xc2   : > { %s975_s5 = sshll.u32 %s715_s27, 5  ;;  %s1944_s7 = scalar_lea.hbm %s2177_s3, %s976_s16 }
  0xc7   : > { %s2179_s20 = smov %s2178_s12  ;;  %s1955_s27 = scalar_lea.hbm %s2178_s12, %s975_s5 }
 0x192   : > { %v546_v17 = vpop.f32.mrb[0].mxu0 }
 0x193   : > { %v619_v19 = vpop.f32.mrb[0].mxu1  ;;  %v1002_v20 = vpop.f32.mrb[1].mxu0 }
 0x194   : > { %v620_v21 = vadd.f32 %v619_v19, %v546_v17  ;;  %v1013_v22 = vpop.f32.mrb[1].mxu1 }
 0x196   : > { %v629_v23 = vadd.f32 %v969_v18, %v620_v21 }
 0x198   : > { %1184 = vtanh.f32 %v629_v23  ;;  %v630_v27 = vmul.f32 0.5, %v629_v23 }
 0x19a   : > { %1186 = vtanh.f32 %v630_v27 }
 0x1a2   : > { %v1185_v25 = vpop.eup %1184 }
 0x1a3   : > { %641 = vrot.lane.b32.xlu0 %v1185_v25, %s1502_s29 }
 0x1a4   : > { %v1187_v28 = vpop.eup %1186 }
 0x1a5   : > { %v632_v29 = vadd.f32 1.0, %v1187_v28 }
 0x1a7   : > { %636 = vrot.lane.b32.xlu0 %v475_v26, %s1503_s18  ;;  %v633_v32 = vmul.f32 0.5, %v632_v29 }
 0x215   : > { %v642_v33 = vpop.permute.xlu0 %641 }
 0x216   : > { %v644_v34 = vmul.f32 %v642_v33, %v633_v32 }
 0x218   : > { %646 = vrot.lane.b32.xlu1 %v644_v34, %s1503_s18 }
 0x219   : > { %v637_v36 = vpop.permute.xlu0 %636 }
 0x21a   : > { %v639_v37 = vmul.f32 %v637_v36, %v633_v32 }
 0x21c   : > { %661 = vperm.xlu1 %1182, %v659_v35  }
 0x220   : > { %664 = vrot.lane.b32.xlu1 %v474_v15, %s1504_s11 }
 0x28a   : > { %v647_v38 = vpop.permute.xlu1 %646 }
 0x28b   : > { %v649_v39 = vadd.f32 %v647_v38, %v639_v37 }
 0x28d   : > { %1188 = vtanh.f32 %v649_v39 }
 0x297   : > { %v1189_v40 = vpop.eup %1188 }
 0x298   : > { %652 = vrot.lane.b32.xlu0 %v1189_v40, %s1502_s29  ;;  %s1933_s29 = scalar_lea.hbm %s2176_s23, %s976_s16  ;;  %s1280_s16 = scalar_lea.vmem %s1939_s10, 32 }
 0x299   : > { %p1281_p0 = scmp.ne.s32.totalorder %s1939_s10, %s1280_s16 }
 0x29b   : > { %v662_v41 = vpop.permute.xlu1 %661  ;;  %p1282_p7 = pnand %p1281_p0, %p2181_p12 }
 0x29c   : > { %vm663_vm4 = vcmp.eq.s32.totalorder %v662_v41, 1 }
 0x29d   : > { %v668_v42 = vsel %vm663_vm4, %v649_v39, %v637_v36  ;;  %p1283_p2 = pneg %p1282_p7 }
 0x29e   : > { %676 = vrot.lane.b32.xlu1 %v668_v42, %s1504_s11  ;;  %s1505_s11 = smov [#allocation11]  }
 0x29f   : > { %v665_v44 = vpop.permute.xlu1 %664  ;;  %s1284_s15 = sshll.u32 %s1505_s11, 4  ;;  %s1285_s15 = int_to_ptr.vmem [resolvable:$false] %s1284_s15 }
 0x2a0   : > { %s1286_s2 = scalar_lea.vmem %s1285_s15, 64  ;;  %p1287_p10 = scmp.lt.s32.totalorder %s1939_s10, %s1285_s15 }
 0x2a1   : > { %p1288_p4 = scmp.lt.s32.totalorder %s1286_s2, %s1280_s16 }
 0x2a3   : > { %p1289_p1 = por %p1288_p4, %p1287_p10 }
 0x2a5   : > { %p1290_p8 = pnand %p1289_p1, %p1283_p2 }
 0x30a   : > { %v653_v43 = vpop.permute.xlu0 %652 }
 0x30b   : > { %v655_v45 = vmul.f32 %v653_v43, %v633_v32 }
 0x30d   : > { %v667_v46 = vsel %vm663_vm4, %v655_v45, %v665_v44  ;;  %v680_v48 = vsel %vm663_vm4, %v655_v45, 0.0 }
 0x30e   : > { %670 = vrot.lane.b32.xlu0 %v667_v46, %s1503_s18 }
 0x310   : > { %v677_v47 = vpop.permute.xlu1 %676 }
 0x311   : > { %679 = vst.msk [vmem:[#allocation3] sm:$0x3] %vm673_vm5, %v677_v47  ;;  %687 = vst.msk [vmem:[%s438_s1] sm:$0x3] %vm673_vm5, %v677_v47 }
 0x312   : > { %682 = vrot.lane.b32.xlu0 %v680_v48, %s1503_s18  ;;  %s1961_s18 = scalar_lea.sflag [#allocation12], %s2180_s8 }
 0x380   : > { %v671_v49 = vpop.permute.xlu0 %670 }
 0x381   : > { %674 = vst.msk [vmem:[#allocation2] sm:$0x3] %vm673_vm5, %v671_v49  ;;  %686 = vst.msk [vmem:[%s431_s0] sm:$0x3] %vm673_vm5, %v671_v49 }
 0x382   : > { %1293 = shalt.err (!%p1290_p8)
}
 0x383   : > { %s1294_s21 = scalar_lea.hbm %s1933_s29, 32  ;;  %s1298_s1 = scalar_lea.hbm %s2176_s23, 64 }
 0x384   : > { %p1295_p13 = scmp.ne.s32.totalorder %s1933_s29, %s1294_s21  ;;  %p1299_p3 = scmp.lt.u32.totalorder %s1933_s29, %s2176_s23 }
 0x385   : > { %p1300_p5 = scmp.lt.u32.totalorder %s1298_s1, %s1294_s21  ;;  %p1302_p0 = scmp.lt.u32.totalorder %s1294_s21, %s1933_s29 }
 0x386   : > { %p1296_p9 = pnand %p1295_p13, %p2181_p12 }
 0x387   : > { %p1301_p6 = por %p1300_p5, %p1299_p3 }
 0x388   : > { %p1297_p11 = pneg %p1296_p9 }
 0x389   : > { %p1303_p7 = por %p1302_p0, %p1301_p6 }
 0x38b   : > { %p1304_p2 = pnand %p1303_p7, %p1297_p11 }
 0x38d   : > { %1307 = shalt.err (!%p1304_p2)
}
 0x38e   : > { %1033 = dma.vmem_to_hbm [thread:$0]  (%p2181_p12), %s1939_s10, 32, %s1933_s29, %s1961_s18  }
 0x38f   : > { %s1308_s12 = scalar_lea.vmem %s1946_s30, 32  ;;  %s1506_s8 = smov [#allocation13]  }
 0x390   : > { %p1309_p10 = scmp.ne.s32.totalorder %s1946_s30, %s1308_s12  ;;  %s1312_s16 = sshll.u32 %s1506_s8, 4  ;;  %s1313_s16 = int_to_ptr.vmem [resolvable:$false] %s1312_s16 }
 0x391   : > { %s1314_s11 = scalar_lea.vmem %s1313_s16, 64  ;;  %p1315_p8 = scmp.lt.s32.totalorder %s1946_s30, %s1313_s16 }
 0x392   : > { %p1310_p4 = pnand %p1309_p10, %p2181_p12  ;;  %p1316_p13 = scmp.lt.s32.totalorder %s1314_s11, %s1308_s12 }
 0x394   : > { %p1311_p1 = pneg %p1310_p4  ;;  %p1317_p9 = por %p1316_p13, %p1315_p8 }
 0x396   : > { %p1318_p11 = pnand %p1317_p9, %p1311_p1 }
 0x398   : > { %1321 = shalt.err (!%p1318_p11)
}
 0x399   : > { %s1322_s10 = scalar_lea.hbm %s1944_s7, 32  ;;  %s1326_s21 = scalar_lea.hbm %s2177_s3, 64 }
 0x39a   : > { %p1323_p3 = scmp.ne.s32.totalorder %s1944_s7, %s1322_s10  ;;  %p1327_p0 = scmp.lt.u32.totalorder %s1944_s7, %s2177_s3 }
 0x39b   : > { %p1328_p7 = scmp.lt.u32.totalorder %s1326_s21, %s1322_s10  ;;  %p1330_p10 = scmp.lt.u32.totalorder %s1322_s10, %s1944_s7 }
 0x39c   : > { %p1324_p5 = pnand %p1323_p3, %p2181_p12 }
 0x39d   : > { %p1329_p2 = por %p1328_p7, %p1327_p0 }
 0x39e   : > { %p1325_p6 = pneg %p1324_p5 }
 0x39f   : > { %p1331_p4 = por %p1330_p10, %p1329_p2 }
 0x3a1   : > { %p1332_p1 = pnand %p1331_p4, %p1325_p6 }
 0x3a3   : > { %1335 = shalt.err (!%p1332_p1)
}
 0x3a4   : > { %1034 = dma.vmem_to_hbm [thread:$0]  (%p2181_p12), %s1946_s30, 32, %s1944_s7, %s1961_s18   ;;  %v683_v50 = vpop.permute.xlu0 %682 }
 0x3a5   : > { %s2182_s1 = scalar_lea.vmem [#allocation10], %s1880_s13  ;;  %s2183_s26 = sand.u32 1, %s1442_s25  }
 0x3a6   : > { %685 = vst.msk [vmem:[%s2182_s1] sm:$0x3] %vm673_vm5, %v683_v50  ;;  %s689_s15 = scalar_lea.sflag [#allocation6], %s2183_s26  ;;  %s1336_s12 = scalar_lea.vmem %s1957_s22, 32 }
 0x3a7   : > { %p1337_p8 = scmp.ne.s32.totalorder %s1957_s22, %s1336_s12  ;;  %p2184_p13 = scmp.ne.s32.totalorder %s2152_s17, 0 }
 0x3a8   : > { %s1507_s4 = smov [#allocation10]  }
 0x3a9   : > { %p1338_p9 = pnand %p1337_p8, %p2184_p13  ;;  %s1340_s8 = sshll.u32 %s1507_s4, 4  ;;  %s1341_s8 = int_to_ptr.vmem [resolvable:$false] %s1340_s8 }
 0x3aa   : > { %s1342_s16 = scalar_lea.vmem %s1341_s8, 64  ;;  %p1343_p3 = scmp.lt.s32.totalorder %s1957_s22, %s1341_s8 }
 0x3ab   : > { %p1339_p11 = pneg %p1338_p9  ;;  %p1344_p5 = scmp.lt.s32.totalorder %s1342_s16, %s1336_s12 }
 0x3ad   : > { %p1345_p6 = por %p1344_p5, %p1343_p3 }
 0x3af   : > { %p1346_p0 = pnand %p1345_p6, %p1339_p11 }
 0x3b1   : > { %1349 = shalt.err (!%p1346_p0)
}
 0x3b2   : > { %s1350_s13 = scalar_lea.hbm %s1955_s27, 32  ;;  %s1354_s18 = scalar_lea.hbm %s2179_s20, 512 }
 0x3b3   : > { %p1351_p12 = scmp.ne.s32.totalorder %s1955_s27, %s1350_s13  ;;  %p1355_p10 = scmp.lt.u32.totalorder %s1955_s27, %s2179_s20 }
 0x3b4   : > { %p1356_p4 = scmp.lt.u32.totalorder %s1354_s18, %s1350_s13  ;;  %p1358_p8 = scmp.lt.u32.totalorder %s1350_s13, %s1955_s27 }
 0x3b5   : > { %p1352_p7 = pnand %p1351_p12, %p2184_p13 }
 0x3b6   : > { %p1357_p1 = por %p1356_p4, %p1355_p10 }
 0x3b7   : > { %p1353_p2 = pneg %p1352_p7 }
 0x3b8   : > { %p1359_p9 = por %p1358_p8, %p1357_p1 }
 0x3ba   : > { %p1360_p11 = pnand %p1359_p9, %p1353_p2 }
 0x3bc   : > { %1363 = shalt.err (!%p1360_p11)
}
 0x3bd   : > { %1032 = dma.vmem_to_hbm [thread:$0]  (%p2184_p13), %s1957_s22, 32, %s1955_s27, %s689_s15  }
 0x3be PF: > { %p1059_p3 = scmp.ge.s32.totalorder %s1490_s14, 2  ;;  %s757_s29 = sand.u32 1, %s1438_s24  }
 0x3bf   : > { %p2185_p5 = scmp.ne.s32.totalorder %s2156_s6, 0  ;;  %s758_s2 = scalar_lea.sflag [#allocation6], %s757_s29 }
 0x3c1   : > { %p1049_p6 = pnand %p1059_p3, %p2185_p5 }
 0x3c3   : > { %1429 = dma.done.wait (!%p1049_p6), %s758_s2, 32  }
 0x3c4   : > { %1431 = vsyncadd (!%p1049_p6), %s758_s2, 4294967264  ;;  %s2186_s21 = sadd.s32 4294967294, %s1490_s14   ;;  %p2187_p0 = scmp.ne.s32.totalorder %s2158_s19, 0 }
 0x3c5   : > { %s766_s0 = sand.u32 1, %s2186_s21  }
 0x3c6   : > { %p1052_p12 = pnand %p1059_p3, %p2187_p0  ;;  %s767_s17 = scalar_lea.sflag [#allocation12], %s766_s0 }
 0x3c8   : > { %1433 = dma.done.wait (!%p1052_p12), %s767_s17, 64  }
 0x3c9   : > { %1435 = vsyncadd (!%p1052_p12), %s767_s17, 4294967232  ;;  %s30_s14 = sadd.s32 1, %s1490_s14   ;;  %s2189_s6 = sld [smem:[#allocation18_spill]] }
 0x3ca   : > { %p2042_p13 = scmp.ge.s32.totalorder %s30_s14, 18   ;;  %s2190_s26 = sld [smem:[#allocation29_spill]] }
 0x3cb   : > { %s2191_s5 = sld [smem:[#allocation19_spill]]  ;;  %s2192_s29 = sld [smem:[#allocation27_spill]] }
 0x3cc   : > { %s2193_s30 = sld [smem:[#allocation20_spill]]  ;;  %s2194_s1 = sld [smem:[#allocation28_spill]] }
 0x3cd   : > { %s2195_s10 = sld [smem:[#allocation23_spill]]  ;;  %s2196_s11 = sld [smem:[#allocation24_spill]] }
 0x3ce   : > { %s2197_s12 = sld [smem:[#allocation25_spill]]  ;;  %s2198_s13 = sld [smem:[#allocation26_spill]] }
 0x3cf   : > { %s2199_s24 = smov %s1442_s25  ;;  %s2200_s25 = smov %s2189_s6 }
 0x3d0   : > { %s2201_s27 = smov %s1454_s28  ;;  %s2203_s8 = smov %s1470_s9 }
 0x3d1   : > { %s2202_s28 = smov %s2191_s5  ;;  %29 = sbr.rel (!%p2042_p13) target bundleno = 23 (0x17), region = 148 }
 0x3d2   : > { %s2204_s9 = smov %s2194_s1 }
 0x3d8   :  { %781 = vsyncpa [#allocation5], 1 }
 0x3d9   :  { %783 = vsyncpa [#allocation5 + $0x1], 1 }
 0x3da   :  { %784 = vsyncpa [#allocation8], 1 }
 0x3db   :  { %786 = vsyncpa [#allocation8 + $0x1], 1 }
 0x3dc   :  { %787 = vsyncpa [#allocation6], 1 }
 0x3dd   :  { %789 = vsyncpa [#allocation6 + $0x1], 1 }
 0x3de   :  { %790 = vsyncpa [#allocation12], 1 }
 0x3df   :  { %792 = vsyncpa [#allocation12 + $0x1], 1 }

</bundles_post_ra>
